<compile_context>
chip_gen: v7x
topology: tpu7x:2x2x1
jax: 0.10.0
libtpu: 0.0.40
codegen_flags: <defaults>
</compile_context>

<pallas_src>
import functools

import jax
import jax.numpy as jnp
from jax.experimental import pallas as pl
from jax.experimental.pallas import tpu as pltpu


def _vmem_capacity_bytes():
    """Per-core VMEM capacity; conservative (v7x) fallback if query fails."""
    try:
        info = pltpu.get_tpu_info()
        cap = getattr(info, "vmem_capacity_bytes", None)
        if cap:
            return int(cap)
    except Exception:
        pass
    return 64 * 1024 * 1024


def _seq_loss_kernel(logits_ref, shift_ref, w_ref, out_ref,
                     m_acc, se_acc, sl_acc, tg_acc, *,
                     alpha, vocab_size, vocab_chunk, block_rows, n_rows):
    """Grid step (ri, vi): one (block_rows, vocab_chunk) logits chunk.

    Online (flash-style) accumulation across the vocab axis; the row-block
    partial sum is emitted on the last vocab chunk.
    """
    ri = pl.program_id(0)
    vi = pl.program_id(1)
    nv = pl.num_programs(1)

    @pl.when(vi == 0)
    def _():
        m_acc[...] = jnp.full_like(m_acc, -jnp.inf)
        se_acc[...] = jnp.zeros_like(se_acc)
        sl_acc[...] = jnp.zeros_like(sl_acc)
        tg_acc[...] = jnp.zeros_like(tg_acc)

    x = logits_ref[...]                       # (TR, VC) native dtype (bf16/f32)
    shift = shift_ref[...]                    # (TR, 1) int32

    # Target gather: (1, VC) lane iota + scalar chunk offset, broadcast against
    # the (TR, 1) shifted target.  Compare/select stay in the native dtype
    # (packed bf16 on v6e/v7x); at most one column per row matches so the
    # native-dtype row sum is exact.
    col = vi * vocab_chunk + jax.lax.broadcasted_iota(jnp.int32, (1, vocab_chunk), 1)
    tgt_hit = jnp.sum(jnp.where(col == shift, x, jnp.zeros_like(x)),
                      axis=-1, keepdims=True).astype(jnp.float32)

    # Online max / log-sum-exp (f32 accumulators, single pass over the chunk).
    chunk_max = jnp.max(x, axis=-1, keepdims=True).astype(jnp.float32)
    m_old = m_acc[...]
    m_new = jnp.maximum(m_old, chunk_max)

    x32 = x.astype(jnp.float32)               # per-chunk cast, exp/sum path only
    se_acc[...] = se_acc[...] * jnp.exp(m_old - m_new) + jnp.sum(
        jnp.exp(x32 - m_new), axis=-1, keepdims=True)
    # NOTE: on v6e/v7x this plain row-sum could be offloaded to the idle MXU
    # (dot with a resident ones vector); kept on the VPU for portability.
    sl_acc[...] = sl_acc[...] + jnp.sum(x32, axis=-1, keepdims=True)
    tg_acc[...] = tg_acc[...] + tgt_hit
    m_acc[...] = m_new

    @pl.when(vi == nv - 1)
    def _():
        w = w_ref[...]                        # (TR, 1) f32, 0 on pad rows
        lse = m_acc[...] + jnp.log(se_acc[...])
        row_sum = ((alpha / vocab_size) * (sl_acc[...] - vocab_size * lse)
                   + (1.0 - alpha) * (tg_acc[...] - lse))
        # Ragged last row block: rows >= n_rows read unspecified data (possibly
        # NaN/Inf) -> remove them with a true select, not via w == 0.
        row = ri * block_rows + jax.lax.broadcasted_iota(
            jnp.int32, (block_rows, 1), 0)
        contrib = jnp.where(row < n_rows, row_sum * w, 0.0)
        out_ref[...] = jnp.broadcast_to(jnp.sum(contrib),
                                        (1, 1, 128)).astype(jnp.float32)


def _pick_tiles(n_rows, vocab, itemsize, max_chunk=2048, target_rows=512):
    """Choose (block_rows, vocab_chunk) from the device VMEM capacity."""
    budget = int(0.4 * _vmem_capacity_bytes())

    # Vocab chunk: full vocab if small; otherwise the largest multiple of 128
    # that divides vocab exactly (no ragged vocab blocks), capped at max_chunk.
    # Fallback for awkward vocab sizes: a single full-vocab chunk.
    if vocab <= max_chunk:
        vc = vocab
    else:
        vc = vocab
        for cand in range(max_chunk, 127, -128):
            if vocab % cand == 0:
                vc = cand
                break

    # Per-row working bytes: double-buffered native input chunk + ~12 B/elem of
    # per-chunk f32 temporaries (cast, exp, select) + f32 accumulator scratch.
    per_row = vc * (2 * itemsize + 12) + 4 * 128 * 4 + 64
    rows = min(target_rows, max(8, budget // per_row))
    # Keep >= 2 row blocks when possible so the "parallel" axis can feed both
    # v7x TensorCores (near-zero cost on single-TC v5e/v6e).
    if n_rows > 8:
        rows = min(rows, ((-(-n_rows // 2) + 7) // 8) * 8)
    rows = max(8, (rows // 8) * 8)
    return rows, vc


def _direction_loss(out_logits, tgt_batch, tgt_freq, tgt_pos, *,
                    numda, gama, alpha=0.05, max_chunk=2048):
    """Loss for one direction (one forward/backward block of the PyTorch module)."""
    seq, batch, vocab = out_logits.shape
    n = seq * batch

    # shifted targets: roll(-1) along seq, last position forced to pad (0)
    shift = jnp.roll(tgt_batch, -1, axis=1).at[:, -1].set(0)       # (batch, seq)
    mask = shift != 0

    # per-row weight, computed once in the wrapper (plain XLA, O(rows)):
    #   w = mask * freq^(-numda) * pos^(gama)
    w = mask.astype(jnp.float32)
    if numda != 0.0:
        w = w * jnp.where(mask, tgt_freq.astype(jnp.float32), 1.0) ** (-numda)
    if gama != 0.0:
        w = w * jnp.where(mask, tgt_pos.astype(jnp.float32), 1.0) ** gama
    # NOTE: count can be 0 if every shifted target is pad -> 0/0, same hazard as
    # the original PyTorch module (kept to preserve semantics).
    count = jnp.sum(mask).astype(jnp.float32)

    # rows = seq*batch, seq-major (matches the PyTorch permute(1, 0, 2) view)
    shift_sb = shift.T.reshape(n, 1).astype(jnp.int32)
    w_sb = w.T.reshape(n, 1)
    logits2d = out_logits.reshape(n, vocab)            # native dtype, no copy

    br, vc = _pick_tiles(n, vocab, out_logits.dtype.itemsize, max_chunk=max_chunk)
    nb = -(-n // br)
    nv = vocab // vc                                   # vc divides vocab (or == vocab)
    n_pad = nb * br
    if n_pad != n:
        # only the tiny per-row arrays are padded; the big logits tensor is
        # read ragged and its out-of-range rows masked in-kernel.
        shift_sb = jnp.pad(shift_sb, ((0, n_pad - n), (0, 0)))
        w_sb = jnp.pad(w_sb, ((0, n_pad - n), (0, 0)))

    kernel = functools.partial(_seq_loss_kernel, alpha=alpha, vocab_size=vocab,
                               vocab_chunk=vc, block_rows=br, n_rows=n)

    vmem_limit = int(0.6 * _vmem_capacity_bytes())

    partials = pl.pallas_call(
        kernel,
        out_shape=jax.ShapeDtypeStruct((nb, 1, 128), jnp.float32),
        grid_spec=pltpu.PrefetchScalarGridSpec(
            num_scalar_prefetch=0,
            grid=(nb, nv),                              # vocab (reduction) last
            in_specs=[
                pl.BlockSpec((br, vc), lambda ri, vi: (ri, vi)),
                pl.BlockSpec((br, 1), lambda ri, vi: (ri, 0)),
                pl.BlockSpec((br, 1), lambda ri, vi: (ri, 0)),
            ],
            out_specs=pl.BlockSpec((1, 1, 128), lambda ri, vi: (ri, 0, 0)),
            scratch_shapes=[pltpu.VMEM((br, 1), jnp.float32)] * 4,
        ),
        compiler_params=pltpu.CompilerParams(
            dimension_semantics=("parallel", "arbitrary"),
            vmem_limit_bytes=vmem_limit),
    )(logits2d, shift_sb, w_sb)

    total = jnp.sum(partials[:, 0, 0])
    return -total / count


def seq_generation_loss(for_out, back_out, back_tgt_batch, for_tgt_batch,
                        back_tgt_freq, for_tgt_freq, back_tgt_pos, for_tgt_pos,
                        numda=0.4, gama=0.4):
    # The two directions stay as separate pallas_calls: fusing them would need
    # an extra full-HBM concatenation of the two logits tensors.
    loss1 = _direction_loss(for_out, for_tgt_batch, for_tgt_freq, for_tgt_pos,
                            numda=numda, gama=gama)
    loss2 = _direction_loss(back_out, back_tgt_batch, back_tgt_freq, back_tgt_pos,
                            numda=numda, gama=gama)
    return loss1 + loss2


def _ref_direction_loss(out_logits, tgt_batch, tgt_freq, tgt_pos,
                        *, numda, gama, alpha=0.05):
    """Pure-JAX reference mirroring the PyTorch forward."""
    seq, batch, vocab = out_logits.shape
    shift = jnp.roll(tgt_batch, -1, axis=1).at[:, -1].set(0)       # (batch, seq)
    shift_sb = shift.T                                             # (seq, batch)
    logp = jax.nn.log_softmax(out_logits.astype(jnp.float32), axis=2)
    one_hot = jax.nn.one_hot(shift_sb, vocab, dtype=jnp.float32)
    tgt = alpha / vocab + (1.0 - alpha) * one_hot
    mask = shift_sb != 0
    w = jnp.ones_like(shift_sb, dtype=jnp.float32)
    if numda != 0.0:
        w = w * jnp.where(mask, tgt_freq.T, 1.0) ** (-numda)
    if gama != 0.0:
        w = w * jnp.where(mask, tgt_pos.T, 1.0) ** gama
    contrib = jnp.sum(logp * tgt, axis=2) * w * mask
    return -jnp.sum(contrib) / jnp.sum(mask)


if __name__ == "__main__":
    key = jax.random.PRNGKey(0)
    # shapes chosen so both directions exercise a ragged last row block
    batch, for_seq, back_seq, vocab = 2, 9, 6, 512

    k = jax.random.split(key, 6)
    for_out = jax.random.normal(k[0], (for_seq, batch, vocab), jnp.float32)
    back_out = jax.random.normal(k[1], (back_seq, batch, vocab), jnp.float32)
    # integer targets in [1, vocab), with some pad (0) tokens at sequence tails
    for_tgt = jax.random.randint(k[2], (batch, for_seq), 1, vocab).at[:, -2:].set(0)
    back_tgt = jax.random.randint(k[3], (batch, back_seq), 1, vocab).at[:, -1:].set(0)
    # word frequencies (positive) and positions (positive)
    for_freq = jax.random.randint(k[4], (batch, for_seq), 1, 100).astype(jnp.float32)
    back_freq = jax.random.randint(k[5], (batch, back_seq), 1, 100).astype(jnp.float32)
    for_pos = jnp.broadcast_to(
        jnp.arange(1, for_seq + 1, dtype=jnp.float32)[None, :], (batch, for_seq))
    back_pos = jnp.broadcast_to(
        jnp.arange(1, back_seq + 1, dtype=jnp.float32)[None, :], (batch, back_seq))

    loss = seq_generation_loss(for_out, back_out, back_tgt, for_tgt,
                               back_freq, for_freq, back_pos, for_pos)
    loss = jax.block_until_ready(loss)

    # sanity check against a pure-JAX reference of the PyTorch semantics
    ref = (_ref_direction_loss(for_out, for_tgt, for_freq, for_pos,
                               numda=0.4, gama=0.4)
           + _ref_direction_loss(back_out, back_tgt, back_freq, back_pos,
                                 numda=0.4, gama=0.4))
    assert jnp.allclose(loss, ref, rtol=1e-4, atol=1e-4), (loss, ref)

    # also exercise the vocab-chunked online-LSE path (multiple vocab grid steps)
    chunked = _direction_loss(for_out, for_tgt, for_freq, for_pos,
                              numda=0.4, gama=0.4, max_chunk=128)
    chunked = jax.block_until_ready(chunked)
    ref_f = _ref_direction_loss(for_out, for_tgt, for_freq, for_pos,
                                numda=0.4, gama=0.4)
    assert jnp.allclose(chunked, ref_f, rtol=1e-4, atol=1e-4), (chunked, ref_f)

    print("KERNEL_OK")
</pallas_src>

<mosaic_0001>
module attributes {stable_mosaic.version = 11 : i64} {
  func.func @_seq_loss_kernel(%arg0: i32, %arg1: i32, %arg2: memref<16x512xf32, #tpu.memory_space<vmem>>, %arg3: memref<16x1xi32, #tpu.memory_space<vmem>>, %arg4: memref<16x1xf32, #tpu.memory_space<vmem>>, %arg5: memref<1x1x128xf32, #tpu.memory_space<vmem>>, %arg6: memref<16x1xf32, #tpu.memory_space<vmem>>, %arg7: memref<16x1xf32, #tpu.memory_space<vmem>>, %arg8: memref<16x1xf32, #tpu.memory_space<vmem>>, %arg9: memref<16x1xf32, #tpu.memory_space<vmem>>) attributes {dimension_semantics = [#tpu.dimension_semantics<parallel>, #tpu.dimension_semantics<arbitrary>], iteration_bounds = array<i64: 2, 1>, scalar_prefetch = 0 : i64, scratch_operands = 4 : i64, tpu.core_type = #tpu.core_type<tc>, window_params = [{transform_indices = @transform_0, window_bounds = array<i64: 16, 512>}, {transform_indices = @transform_1, window_bounds = array<i64: 16, 1>}, {transform_indices = @transform_2, window_bounds = array<i64: 16, 1>}, {transform_indices = @transform_3, window_bounds = array<i64: 1, 1, 128>}]} {
    %c0_i32 = arith.constant 0 : i32
    %0 = arith.cmpi eq, %arg1, %c0_i32 : i32
    %1 = arith.extui %0 : i1 to i32
    %c0_i32_0 = arith.constant 0 : i32
    %2 = arith.cmpi ne, %1, %c0_i32_0 : i32
    scf.if %2 {
      %cst_26 = arith.constant 0xFF800000 : f32
      %43 = vector.broadcast %cst_26 : f32 to vector<16x1xf32>
      %c0_27 = arith.constant 0 : index
      %c0_28 = arith.constant 0 : index
      %44 = vector.load %arg6[%c0_27, %c0_28] : memref<16x1xf32, #tpu.memory_space<vmem>>, vector<16x1xf32>
      tpu.vector_store %arg6[%c0_27, %c0_28], %43 {strides = array<i32>} : memref<16x1xf32, #tpu.memory_space<vmem>>, vector<16x1xf32>,
      %cst_29 = arith.constant 0.000000e+00 : f32
      %45 = vector.broadcast %cst_29 : f32 to vector<16x1xf32>
      %c0_30 = arith.constant 0 : index
      %c0_31 = arith.constant 0 : index
      %46 = vector.load %arg7[%c0_30, %c0_31] : memref<16x1xf32, #tpu.memory_space<vmem>>, vector<16x1xf32>
      tpu.vector_store %arg7[%c0_30, %c0_31], %45 {strides = array<i32>} : memref<16x1xf32, #tpu.memory_space<vmem>>, vector<16x1xf32>,
      %cst_32 = arith.constant 0.000000e+00 : f32
      %47 = vector.broadcast %cst_32 : f32 to vector<16x1xf32>
      %c0_33 = arith.constant 0 : index
      %c0_34 = arith.constant 0 : index
      %48 = vector.load %arg8[%c0_33, %c0_34] : memref<16x1xf32, #tpu.memory_space<vmem>>, vector<16x1xf32>
      tpu.vector_store %arg8[%c0_33, %c0_34], %47 {strides = array<i32>} : memref<16x1xf32, #tpu.memory_space<vmem>>, vector<16x1xf32>,
      %cst_35 = arith.constant 0.000000e+00 : f32
      %49 = vector.broadcast %cst_35 : f32 to vector<16x1xf32>
      %c0_36 = arith.constant 0 : index
      %c0_37 = arith.constant 0 : index
      %50 = vector.load %arg9[%c0_36, %c0_37] : memref<16x1xf32, #tpu.memory_space<vmem>>, vector<16x1xf32>
      tpu.vector_store %arg9[%c0_36, %c0_37], %49 {strides = array<i32>} : memref<16x1xf32, #tpu.memory_space<vmem>>, vector<16x1xf32>,
    } else {
    }
    %c0 = arith.constant 0 : index
    %c0_1 = arith.constant 0 : index
    %3 = vector.load %arg2[%c0, %c0_1] : memref<16x512xf32, #tpu.memory_space<vmem>>, vector<16x512xf32>
    %c0_2 = arith.constant 0 : index
    %c0_3 = arith.constant 0 : index
    %4 = vector.load %arg3[%c0_2, %c0_3] : memref<16x1xi32, #tpu.memory_space<vmem>>, vector<16x1xi32>
    %c512_i32 = arith.constant 512 : i32
    %5 = arith.muli %arg1, %c512_i32 : i32
    %6 = tpu.iota {dimensions = array<i32: 1>} : vector<1x512xi32>
    %7 = vector.broadcast %5 : i32 to vector<1x512xi32>
    %8 = arith.addi %7, %6 : vector<1x512xi32>
    %9 = vector.broadcast %8 : vector<1x512xi32> to vector<16x512xi32>
    %10 = vector.broadcast %4 : vector<16x1xi32> to vector<16x512xi32>
    %11 = arith.cmpi eq, %9, %10 : vector<16x512xi32>
    %cst = arith.constant 0.000000e+00 : f32
    %12 = vector.broadcast %cst : f32 to vector<16x512xf32>
    %13 = arith.select %11, %3, %12 : vector<16x512xi1>, vector<16x512xf32>
    %cst_4 = arith.constant dense<0.000000e+00> : vector<16xf32>
    %14 = vector.multi_reduction <add>, %13, %cst_4 [1] : vector<16x512xf32> to vector<16xf32>
    %15 = vector.shape_cast %14 : vector<16xf32> to vector<16x1xf32>
    %cst_5 = arith.constant dense<0xFF800000> : vector<16xf32>
    %16 = vector.multi_reduction <maximumf>, %3, %cst_5 [1] : vector<16x512xf32> to vector<16xf32>
    %17 = vector.shape_cast %16 : vector<16xf32> to vector<16x1xf32>
    %c0_6 = arith.constant 0 : index
    %c0_7 = arith.constant 0 : index
    %18 = vector.load %arg6[%c0_6, %c0_7] : memref<16x1xf32, #tpu.memory_space<vmem>>, vector<16x1xf32>
    %19 = arith.maximumf %18, %17 : vector<16x1xf32>
    %c0_8 = arith.constant 0 : index
    %c0_9 = arith.constant 0 : index
    %20 = vector.load %arg7[%c0_8, %c0_9] : memref<16x1xf32, #tpu.memory_space<vmem>>, vector<16x1xf32>
    %21 = arith.subf %18, %19 : vector<16x1xf32>
    %22 = math.exp %21 : vector<16x1xf32>
    %23 = arith.mulf %20, %22 : vector<16x1xf32>
    %24 = vector.broadcast %19 : vector<16x1xf32> to vector<16x512xf32>
    %25 = arith.subf %3, %24 : vector<16x512xf32>
    %26 = math.exp %25 : vector<16x512xf32>
    %cst_10 = arith.constant dense<0.000000e+00> : vector<16xf32>
    %27 = vector.multi_reduction <add>, %26, %cst_10 [1] : vector<16x512xf32> to vector<16xf32>
    %28 = vector.shape_cast %27 : vector<16xf32> to vector<16x1xf32>
    %29 = arith.addf %23, %28 : vector<16x1xf32>
    %c0_11 = arith.constant 0 : index
    %c0_12 = arith.constant 0 : index
    %30 = vector.load %arg7[%c0_11, %c0_12] : memref<16x1xf32, #tpu.memory_space<vmem>>, vector<16x1xf32>
    tpu.vector_store %arg7[%c0_11, %c0_12], %29 {strides = array<i32>} : memref<16x1xf32, #tpu.memory_space<vmem>>, vector<16x1xf32>,
    %c0_13 = arith.constant 0 : index
    %c0_14 = arith.constant 0 : index
    %31 = vector.load %arg8[%c0_13, %c0_14] : memref<16x1xf32, #tpu.memory_space<vmem>>, vector<16x1xf32>
    %cst_15 = arith.constant dense<0.000000e+00> : vector<16xf32>
    %32 = vector.multi_reduction <add>, %3, %cst_15 [1] : vector<16x512xf32> to vector<16xf32>
    %33 = vector.shape_cast %32 : vector<16xf32> to vector<16x1xf32>
    %34 = arith.addf %31, %33 : vector<16x1xf32>
    %c0_16 = arith.constant 0 : index
    %c0_17 = arith.constant 0 : index
    %35 = vector.load %arg8[%c0_16, %c0_17] : memref<16x1xf32, #tpu.memory_space<vmem>>, vector<16x1xf32>
    tpu.vector_store %arg8[%c0_16, %c0_17], %34 {strides = array<i32>} : memref<16x1xf32, #tpu.memory_space<vmem>>, vector<16x1xf32>,
    %c0_18 = arith.constant 0 : index
    %c0_19 = arith.constant 0 : index
    %36 = vector.load %arg9[%c0_18, %c0_19] : memref<16x1xf32, #tpu.memory_space<vmem>>, vector<16x1xf32>
    %37 = arith.addf %36, %15 : vector<16x1xf32>
    %c0_20 = arith.constant 0 : index
    %c0_21 = arith.constant 0 : index
    %38 = vector.load %arg9[%c0_20, %c0_21] : memref<16x1xf32, #tpu.memory_space<vmem>>, vector<16x1xf32>
    tpu.vector_store %arg9[%c0_20, %c0_21], %37 {strides = array<i32>} : memref<16x1xf32, #tpu.memory_space<vmem>>, vector<16x1xf32>,
    %c0_22 = arith.constant 0 : index
    %c0_23 = arith.constant 0 : index
    %39 = vector.load %arg6[%c0_22, %c0_23] : memref<16x1xf32, #tpu.memory_space<vmem>>, vector<16x1xf32>
    tpu.vector_store %arg6[%c0_22, %c0_23], %19 {strides = array<i32>} : memref<16x1xf32, #tpu.memory_space<vmem>>, vector<16x1xf32>,
    %c0_i32_24 = arith.constant 0 : i32
    %40 = arith.cmpi eq, %arg1, %c0_i32_24 : i32
    %41 = arith.extui %40 : i1 to i32
    %c0_i32_25 = arith.constant 0 : i32
    %42 = arith.cmpi ne, %41, %c0_i32_25 : i32
    scf.if %42 {
      %c0_26 = arith.constant 0 : index
      %c0_27 = arith.constant 0 : index
      %43 = vector.load %arg4[%c0_26, %c0_27] : memref<16x1xf32, #tpu.memory_space<vmem>>, vector<16x1xf32>
      %c0_28 = arith.constant 0 : index
      %c0_29 = arith.constant 0 : index
      %44 = vector.load %arg6[%c0_28, %c0_29] : memref<16x1xf32, #tpu.memory_space<vmem>>, vector<16x1xf32>
      %c0_30 = arith.constant 0 : index
      %c0_31 = arith.constant 0 : index
      %45 = vector.load %arg7[%c0_30, %c0_31] : memref<16x1xf32, #tpu.memory_space<vmem>>, vector<16x1xf32>
      %46 = math.log %45 : vector<16x1xf32>
      %47 = arith.addf %44, %46 : vector<16x1xf32>
      %c0_32 = arith.constant 0 : index
      %c0_33 = arith.constant 0 : index
      %48 = vector.load %arg8[%c0_32, %c0_33] : memref<16x1xf32, #tpu.memory_space<vmem>>, vector<16x1xf32>
      %cst_34 = arith.constant 5.120000e+02 : f32
      %49 = vector.broadcast %cst_34 : f32 to vector<16x1xf32>
      %50 = arith.mulf %49, %47 : vector<16x1xf32>
      %51 = arith.subf %48, %50 : vector<16x1xf32>
      %cst_35 = arith.constant 9.76562514E-5 : f32
      %52 = vector.broadcast %cst_35 : f32 to vector<16x1xf32>
      %53 = arith.mulf %52, %51 : vector<16x1xf32>
      %c0_36 = arith.constant 0 : index
      %c0_37 = arith.constant 0 : index
      %54 = vector.load %arg9[%c0_36, %c0_37] : memref<16x1xf32, #tpu.memory_space<vmem>>, vector<16x1xf32>
      %55 = arith.subf %54, %47 : vector<16x1xf32>
      %cst_38 = arith.constant 0.949999988 : f32
      %56 = vector.broadcast %cst_38 : f32 to vector<16x1xf32>
      %57 = arith.mulf %56, %55 : vector<16x1xf32>
      %58 = arith.addf %53, %57 : vector<16x1xf32>
      %c16_i32 = arith.constant 16 : i32
      %59 = arith.muli %arg0, %c16_i32 : i32
      %60 = tpu.iota {dimensions = array<i32: 0>} : vector<16x1xi32>
      %61 = vector.broadcast %59 : i32 to vector<16x1xi32>
      %62 = arith.addi %61, %60 : vector<16x1xi32>
      %c18_i32 = arith.constant 18 : i32
      %63 = vector.broadcast %c18_i32 : i32 to vector<16x1xi32>
      %64 = arith.cmpi slt, %62, %63 : vector<16x1xi32>
      %65 = arith.mulf %58, %43 : vector<16x1xf32>
      %cst_39 = arith.constant 0.000000e+00 : f32
      %66 = vector.broadcast %cst_39 : f32 to vector<16x1xf32>
      %67 = arith.select %64, %65, %66 : vector<16x1xi1>, vector<16x1xf32>
      %68 = vector.shape_cast %67 : vector<16x1xf32> to vector<1x16x1xf32>
      %cst_40 = arith.constant dense<0.000000e+00> : vector<1xf32>
      %69 = vector.multi_reduction <add>, %68, %cst_40 [1, 2] : vector<1x16x1xf32> to vector<1xf32>
      %70 = vector.shape_cast %69 : vector<1xf32> to vector<1x1x1xf32>
      %71 = vector.extract %70[0, 0, 0] : f32 from vector<1x1x1xf32>
      %72 = vector.broadcast %71 : f32 to vector<1x1x128xf32>
      %c0_41 = arith.constant 0 : index
      %c0_42 = arith.constant 0 : index
      %c0_43 = arith.constant 0 : index
      %73 = vector.load %arg5[%c0_41, %c0_42, %c0_43] : memref<1x1x128xf32, #tpu.memory_space<vmem>>, vector<1x1x128xf32>
      tpu.vector_store %arg5[%c0_41, %c0_42, %c0_43], %72 {strides = array<i32>} : memref<1x1x128xf32, #tpu.memory_space<vmem>>, vector<1x1x128xf32>,
    } else {
    }
    return
  }
  func.func @transform_0(%arg0: i32, %arg1: i32) -> (i32, i32) {
    %c0_i32 = arith.constant 0 : i32
    return %arg0, %arg1 : i32, i32
  }
  func.func @transform_1(%arg0: i32, %arg1: i32) -> (i32, i32) {
    %c0_i32 = arith.constant 0 : i32
    %c0_i32_0 = arith.constant 0 : i32
    return %arg0, %c0_i32 : i32, i32
  }
  func.func @transform_2(%arg0: i32, %arg1: i32) -> (i32, i32) {
    %c0_i32 = arith.constant 0 : i32
    %c0_i32_0 = arith.constant 0 : i32
    return %arg0, %c0_i32 : i32, i32
  }
  func.func @transform_3(%arg0: i32, %arg1: i32) -> (i32, i32, i32) {
    %c0_i32 = arith.constant 0 : i32
    %c0_i32_0 = arith.constant 0 : i32
    %c0_i32_1 = arith.constant 0 : i32
    return %arg0, %c0_i32, %c0_i32_0 : i32, i32, i32
  }
}

</mosaic_0001>

<bundles_post_ra>
// kernel: tpu_custom_call.1
= control target key start
LH: loop header
LB: loop body
LE: loop exit
PB: predicated region body
PF: predicated region fallthrough
CT: control target
= control target key end

     0   :  { %8 = vsyncpa [#allocation7], 0  ;;  %s1134_s0 = inlined_call_operand.hbm [shape: f32[18,512], index: 0, kind: input, shape index: {}]   ;;  %s1135_s1 = inlined_call_operand.vmem [shape: s32[32,1], index: 1, kind: input, shape index: {}]   ;;  %s1136_s2 = inlined_call_operand.vmem [shape: f32[32,1], index: 2, kind: input, shape index: {}]   ;;  %s1137_s3 = inlined_call_operand.hbm [shape: f32[2,1,128], index: 3, kind: output, shape index: {}]  }
   0x1   :  { %10 = vsyncpa [#allocation7 + $0x1], 0 }
   0x2   :  { %11 = vsyncpa [#allocation8], 0 }
   0x3   :  { %13 = vsyncpa [#allocation8 + $0x1], 0  ;;  %s852_s12 = smov 0   ;;  %s854_s13 = smov 0  }
   0x4   :  { %s856_s14 = smov 0   ;;  %s858_s15 = smov 0  }
   0x5   :  { %s860_s16 = smov 0   ;;  %s862_s17 = smov 0  }
   0x6 LB: > { %s598_s18 = sadd.s32 4294967295, %s823_s17   ;;  %s599_s19 = sadd.s32 4294967294, %s823_s17   ;;  %s823_s17 = sphi %s862_s17, %s19_s17   ;;  %s819_s16 = sphi %s860_s16, %s1148_s16   ;;  %s815_s15 = sphi %s858_s15, %s1147_s15   ;;  %s811_s14 = sphi %s856_s14, %s1146_s14   ;;  %s807_s13 = sphi %s854_s13, %s1145_s13   ;;  %s803_s12 = sphi %s852_s12, %s1144_s12  }
   0x7   : > { %s31_s20 = sadd.s32 1, %s819_s16  ;;  %s40_s21 = sadd.s32 1, %s811_s14 }
   0x8   : > { %p33_p0 = scmp.ge.s32.totalorder %s31_s20, 2  ;;  %p47_p1 = scmp.ne.s32.totalorder %s811_s14, %s807_s13 }
   0x9   : > { %p48_p2 = scmp.eq.s32.totalorder %s823_s17, 0  ;;  %p53_p3 = scmp.ne.s32.totalorder %s807_s13, %s803_s12 }
   0xa   : > { %s1150_s20 = smov (%p33_p0, %s31_s20), 0  ;;  %p54_p5 = scmp.eq.s32.totalorder %s598_s18, 0 }
   0xb   : > { %p49_p4 = por %p48_p2, %p47_p1  ;;  %s35_s22 = ssub.s32 %s819_s16, %s1150_s20 }
   0xc   : > { %p129_p6 = scmp.eq.s32.totalorder %s598_s18, 1  ;;  %p38_p7 = scmp.eq.s32.totalorder %s35_s22, 0 }
   0xd   : > { %p895_p8 = por %p54_p5, %p53_p3  ;;  %p135_p10 = scmp.eq.s32.totalorder %s599_s19, 1 }
   0xe   : > { %p899_p9 = por %p129_p6, %p47_p1  ;;  %p1138_p12 = scmp.ge.s32.totalorder %s823_s17, 2 }
   0xf   : > { %s904_s25 = scalar_select %p38_p7, %s811_s14, %s40_s21  }
  0x10   : > { %p906_p11 = por %p135_p10, %p53_p3  ;;  %151 = sbr.rel (%p1138_p12) target bundleno = 58 (0x3a), region = 16 }
  0x12   : > { %s1141_s26 = scalar_select %p906_p11, 1, 0 }
  0x17   : > { %154 = sbr.rel (!%p49_p4) target bundleno = 58 (0x3a), region = 20  ;;  %s155_s27 = sand.u32 (%p49_p4), 1, %s811_s14  }
  0x18   : > { %s603_s28 = sshll.u32 (%p49_p4), %s819_s16, 1  ;;  %s602_s29 = sshll.u32 (%p49_p4), %s155_s27, 6 }
  0x19   : > { %s162_s30 = ssub.s32 (%p49_p4), 3, %s603_s28  ;;  %s918_s6 = scalar_lea.sflag (%p49_p4), [#allocation7], %s155_s27 }
  0x1a   : > { %p163_p13 = scmp.lt.s32.totalorder (%p49_p4), %s162_s30, 2  ;;  %s159_s7 = scalar_lea.vmem (%p49_p4), [#allocation6], %s602_s29 }
  0x1e   : > { %s1152_s30 = smov (!%p163_p13, %s162_s30), 2 }
  0x1f   : > { %s915_s4 = sshll.u32 %s1152_s30, 9 }
  0x20   : > { %s168_s5 = ssub.s32 1024, %s915_s4 }
  0x21   : > { %169 = vsyncadd %s918_s6, %s168_s5  ;;  %p606_p0 = scmp.ne.s32.totalorder %s915_s4, 0  ;;  %s623_s8 = sshll.u32 %s819_s16, 10 }
  0x22   : > { %s926_s11 = scalar_lea.hbm %s1134_s0, %s623_s8  ;;  %s176_s18 = sshll.u32 %s159_s7, 4  ;;  %s928_s18 = int_to_ptr.vmem [resolvable:$true] %s176_s18 }
  0x23   : > { %s713_s19 = scalar_lea.hbm %s926_s11, %s915_s4  ;;  %s717_s27 = scalar_lea.hbm %s1134_s0, 1536 }
  0x24   : > { %p714_p1 = scmp.ne.s32.totalorder %s926_s11, %s713_s19  ;;  %p718_p4 = scmp.lt.u32.totalorder %s926_s11, %s1134_s0 }
  0x25   : > { %p719_p5 = scmp.lt.u32.totalorder %s717_s27, %s713_s19  ;;  %p721_p7 = scmp.lt.u32.totalorder %s713_s19, %s926_s11 }
  0x26   : > { %p715_p2 = pnand %p714_p1, %p606_p0 }
  0x27   : > { %p720_p6 = por %p719_p5, %p718_p4 }
  0x28   : > { %p716_p3 = pneg %p715_p2 }
  0x29   : > { %p722_p10 = por %p721_p7, %p720_p6 }
  0x2b   : > { %p723_p13 = pnand %p722_p10, %p716_p3 }
  0x2d   : > { %726 = shalt.err (!%p723_p13)
}
  0x2e   : > { %s727_s30 = scalar_lea.vmem %s928_s18, %s915_s4  ;;  %s825_s5 = smov [#allocation6]  }
  0x2f   : > { %p728_p1 = scmp.ne.s32.totalorder %s928_s18, %s727_s30  ;;  %s731_s7 = sshll.u32 %s825_s5, 4  ;;  %s732_s7 = int_to_ptr.vmem [resolvable:$false] %s731_s7 }
  0x30   : > { %s733_s8 = scalar_lea.vmem %s732_s7, 2048  ;;  %p734_p11 = scmp.lt.s32.totalorder %s928_s18, %s732_s7 }
  0x31   : > { %p729_p2 = pnand %p728_p1, %p606_p0  ;;  %p735_p4 = scmp.lt.s32.totalorder %s733_s8, %s727_s30 }
  0x33   : > { %p730_p12 = pneg %p729_p2  ;;  %p736_p5 = por %p735_p4, %p734_p11 }
  0x35   : > { %p737_p6 = pnand %p736_p5, %p730_p12 }
  0x37   : > { %740 = shalt.err (!%p737_p6)
}
  0x38   : > { %s826_s9 = smov 512   ;;  %s827_s10 = smov 32  }
  0x39   : > { %182 = dma.hbm_to_vmem [thread:$0]  (%p606_p0), %s926_s11, %s915_s4, %s928_s18, %s918_s6, %s826_s9, %s826_s9, %s827_s10  }
  0x3a PF: > { %p611_p3 = scmp.ge.s32.totalorder %s823_s17, 1  ;;  %p202_p7 = scmp.lt.s32.totalorder %s823_s17, 3 }
  0x3c   : > { %p203_p10 = pnand %p611_p3, %p202_p7 }
  0x3d   : > { %s958_s19 = sand.u32 (!%p203_p10), 1, %s807_s13  }
  0x3e   : > { %206 = sbr.rel (%p203_p10) target bundleno = 774 (0x306), region = 32  ;;  %s612_s21 = sshll.u32 (!%p203_p10), %s958_s19, 6 }
  0x3f   : > { %s209_s22 = scalar_lea.sflag (!%p203_p10), [#allocation7], %s958_s19  ;;  %s212_s27 = scalar_lea.vmem (!%p203_p10), [#allocation6], %s612_s21 }
  0x45   : > { %794 = dma.done.wait (%p895_p8), %s209_s22, 1024  }
  0x46   : > { %796 = vsyncadd (%p895_p8), %s209_s22, 4294966272  ;;  %vm267_vm0 = vcmask 7168   ;;  %v828_v0 = vmov -inf   ;;  %v968_v1 = vld [vmem:[%s212_s27] sm:$0xff]  ;;  %v970_v2 = vld [vmem:[%s212_s27 + $0x8] sm:$0xff]  ;;  %v829_v15 = vmov 0   ;;  %v287_v27 = vlaneseq }
  0x47   : > { %268 = vst.msk [vmem:[#allocation2] sm:$0xff] %vm267_vm0, %v828_v0  ;;  %269 = vst.msk [vmem:[#allocation2 + $0x8] sm:$0xff] %vm267_vm0, %v828_v0  ;;  %v972_v3 = vld [vmem:[%s212_s27 + $0x10] sm:$0xff]  ;;  %v974_v4 = vld [vmem:[%s212_s27 + $0x18] sm:$0xff]  ;;  %687 = vset.pattern.permute.xlu1 %v829_v15  ;;  %688 = vset.pattern.permute.xlu0 %v829_v15  ;;  %s613_s23 = sshll.u32 %s815_s15, 1  ;;  %v830_v17 = vmov 0.0  }
  0x48   : > { %v329_v5 = vmax.f32 %v968_v1, %v972_v3  ;;  %v978_v6 = vld [vmem:[%s212_s27 + $0x20] sm:$0xff]  ;;  %v980_v7 = vld [vmem:[%s212_s27 + $0x28] sm:$0xff]  ;;  %v330_v8 = vmax.f32 %v970_v2, %v974_v4  ;;  %v984_v9 = vld [vmem:[%s212_s27 + $0x30] sm:$0xff]  ;;  %p252_p8 = scmp.lt.s32.totalorder %s613_s23, 3  ;;  %270 = vst.msk [vmem:[#allocation3] sm:$0xff] %vm267_vm0, %v830_v17  ;;  %v288_v28 = vand.u32 127, %v287_v27 }
  0x49   : > { %v986_v10 = vld [vmem:[%s212_s27 + $0x38] sm:$0xff]  ;;  %v334_v11 = vmax.f32 %v978_v6, %v984_v9  ;;  %271 = vst.msk [vmem:[#allocation3 + $0x8] sm:$0xff] %vm267_vm0, %v830_v17  ;;  %272 = vst.msk [vmem:[#allocation4] sm:$0xff] %vm267_vm0, %v830_v17  ;;  %s617_s28 = sshll.u32 %s815_s15, 4  ;;  %s243_s7 = scalar_lea.vmem [#allocation9], %s958_s19 }
  0x4a   : > { %v335_v12 = vmax.f32 %v980_v7, %v986_v10  ;;  %v331_v13 = vmax.f32 %v329_v5, %v330_v8  ;;  %s1154_s23 = smov (!%p252_p8, %s613_s23), 3  ;;  %273 = vst.msk [vmem:[#allocation4 + $0x8] sm:$0xff] %vm267_vm0, %v830_v17  ;;  %274 = vst.msk [vmem:[#allocation5] sm:$0xff] %vm267_vm0, %v830_v17  ;;  %v289_v29 = vadd.s32 128, %v288_v28  ;;  %v290_v31 = vadd.s32 256, %v288_v28  ;;  %s497_s8 = sshll.u32 %s243_s7, 4  ;;  %s1080_s8 = int_to_ptr.vmem [resolvable:$true] %s497_s8 }
  0x4b   : > { %s614_s4 = sshll.u32 %s1154_s23, 3  ;;  %275 = vst.msk [vmem:[#allocation5 + $0x8] sm:$0xff] %vm267_vm0, %v830_v17  ;;  %v1028_v32 = vadd.s32 384, %v288_v28  ;;  %s1087_s22 = scalar_lea.hbm %s1137_s3, %s617_s28 }
  0x4c   : > { %332 = vmax.xlane.f32.xlu0 %v331_v13  ;;  %v336_v14 = vmax.f32 %v334_v11, %v335_v12  ;;  %s255_s18 = scalar_lea.vmem %s1135_s1, %s614_s4  ;;  %s261_s5 = scalar_lea.vmem %s1136_s2, %s614_s4 }
  0x4d   : > { %v284_v16 = vld [vmem:[%s255_s18] sm:$0xff]  ;;  %v285_v26 = vld [vmem:[%s255_s18 + $0x8] sm:$0xff]  ;;  %s485_s27 = scalar_lea.sflag [#allocation8], %s958_s19  ;;  %s741_s23 = scalar_lea.vmem %s1080_s8, 16 }
  0x4e   : > { %v1007_v18 = vld [vmem:[#allocation2] sm:$0xff]  ;;  %v1012_v21 = vld [vmem:[#allocation2 + $0x8] sm:$0xff]  ;;  %p742_p11 = scmp.ne.s32.totalorder %s1080_s8, %s741_s23  ;;  %s831_s4 = smov [#allocation9]  }
  0x4f   : > { %s745_s6 = sshll.u32 %s831_s4, 4  ;;  %s746_s6 = int_to_ptr.vmem [resolvable:$false] %s745_s6 }
  0x50   : > { %337 = vmax.xlane.f32.xlu0 %v336_v14  ;;  %p743_p12 = pnand %p742_p11, %p899_p9  ;;  %s747_s11 = scalar_lea.vmem %s746_s6, 32 }
  0x51   : > { %p748_p13 = scmp.lt.s32.totalorder %s1080_s8, %s746_s6  ;;  %p749_p1 = scmp.lt.s32.totalorder %s747_s11, %s741_s23 }
  0x52   : > { %p744_p0 = pneg %p743_p12 }
  0x53   : > { %p750_p2 = por %p749_p1, %p748_p13 }
  0x55   : > { %p751_p4 = pnand %p750_p2, %p744_p0 }
  0x66   : > { %298 = vperm.xlu0 %688, %v284_v16  }
  0xd9   : > { %v333_v19 = vpop.xlane.xlu0 %332 }
  0xda   : > { %v1010_v20 = vmax.f32 %v1007_v18, %v333_v19  ;;  %v404_v19 = vadd.f32 %v970_v2, %v968_v1 }
  0xdc   : > { %v345_v22 = vsub.f32 %v1007_v18, %v1010_v20  ;;  %424 = vst.msk [vmem:[#allocation2] sm:$0xff] %vm267_vm0, %v1010_v20  ;;  %355 = vperm.xlu1 %687, %v1010_v20   ;;  %v419_v18 = vld [vmem:[#allocation5 + $0x8] sm:$0xff] }
  0xdd   : > { %v338_v23 = vpop.xlane.xlu0 %337 }
  0xde   : > { %v1020_v24 = vmax.f32 %v1012_v21, %v338_v23 }
  0xe0   : > { %v346_v25 = vsub.f32 %v1012_v21, %v1020_v24  ;;  %425 = vst.msk [vmem:[#allocation2 + $0x8] sm:$0xff] %vm267_vm0, %v1020_v24  ;;  %360 = vperm.xlu1 %687, %v1020_v24   ;;  %v402_v21 = vld [vmem:[#allocation4] sm:$0xff] }
  0xe4   : > { %301 = vperm.xlu1 %687, %v285_v26  }
  0xe5   : > { %v299_v30 = vpop.permute.xlu0 %298 }
  0xe6   : > { %vm303_vm1 = vcmp.eq.s32.totalorder %v288_v28, %v299_v30  ;;  %vm304_vm2 = vcmp.eq.s32.totalorder %v289_v29, %v299_v30  ;;  %vm305_vm3 = vcmp.eq.s32.totalorder %v290_v31, %v299_v30  ;;  %vm306_vm4 = vcmp.eq.s32.totalorder %v1028_v32, %v299_v30 }
  0xe7   : > { %v311_v33 = vsel %vm303_vm1, %v968_v1, 0.0  ;;  %v312_v34 = vsel %vm304_vm2, %v970_v2, 0.0  ;;  %v313_v35 = vsel %vm305_vm3, %v972_v3, 0.0  ;;  %v314_v37 = vsel %vm306_vm4, %v974_v4, 0.0 }
  0xe8   : > { %v319_v36 = vadd.f32 %v312_v34, %v311_v33  ;;  %v405_v30 = vadd.f32 %v404_v19, %v972_v3 }
  0xea   : > { %v320_v38 = vadd.f32 %v319_v36, %v313_v35  ;;  %v406_v35 = vadd.f32 %v405_v30, %v974_v4 }
  0xec   : > { %v321_v39 = vadd.f32 %v320_v38, %v314_v37 }
  0xee   : > { %322 = vadd.xlane.f32.xlu0 %v321_v39  ;;  %v344_v39 = vld [vmem:[#allocation3 + $0x8] sm:$0xff] }
 0x15b   : > { %v356_v40 = vpop.permute.xlu1 %355 }
 0x15c   : > { %v363_v41 = vsub.f32 %v968_v1, %v356_v40  ;;  %v364_v42 = vsub.f32 %v970_v2, %v356_v40  ;;  %v365_v43 = vsub.f32 %v972_v3, %v356_v40  ;;  %v366_v44 = vsub.f32 %v974_v4, %v356_v40 }
 0x15d   : > { %v347_v3 = vmul.f32 1.442695, %v345_v22  ;;  %v349_v4 = vmul.f32 1.442695, %v346_v25 }
 0x15e   : > { %v371_v45 = vmul.f32 1.442695, %v363_v41  ;;  %v373_v46 = vmul.f32 1.442695, %v364_v42  ;;  %v375_v47 = vmul.f32 1.442695, %v365_v43 }
 0x15f   : > { %v377_v48 = vmul.f32 1.442695, %v366_v44  ;;  %v361_v49 = vpop.permute.xlu1 %360 }
 0x160   : > { %689 = vpow2.f32 %v371_v45  ;;  %v367_v50 = vsub.f32 %v978_v6, %v361_v49  ;;  %v368_v51 = vsub.f32 %v980_v7, %v361_v49  ;;  %v369_v52 = vsub.f32 %v984_v9, %v361_v49  ;;  %v403_v45 = vld [vmem:[#allocation4 + $0x8] sm:$0xff] }
 0x161   : > { %691 = vpow2.f32 %v373_v46  ;;  %v370_v53 = vsub.f32 %v986_v10, %v361_v49 }
 0x162   : > { %693 = vpow2.f32 %v375_v47  ;;  %v379_v54 = vmul.f32 1.442695, %v367_v50  ;;  %v381_v55 = vmul.f32 1.442695, %v368_v51  ;;  %v383_v56 = vmul.f32 1.442695, %v369_v52 }
 0x163   : > { %695 = vpow2.f32 %v377_v48  ;;  %v385_v57 = vmul.f32 1.442695, %v370_v53  ;;  %v302_v58 = vpop.permute.xlu1 %301  ;;  %v431_v51 = vld [vmem:[#allocation2] sm:$0xff] }
 0x164   : > { %697 = vpow2.f32 %v379_v54  ;;  %vm307_vm5 = vcmp.eq.s32.totalorder %v288_v28, %v302_v58  ;;  %vm308_vm6 = vcmp.eq.s32.totalorder %v289_v29, %v302_v58  ;;  %vm309_vm7 = vcmp.eq.s32.totalorder %v290_v31, %v302_v58 }
 0x165   : > { %699 = vpow2.f32 %v381_v55  ;;  %v315_v0 = vsel %vm307_vm5, %v978_v6, 0.0  ;;  %v316_v5 = vsel %vm308_vm6, %v980_v7, 0.0  ;;  %v317_v26 = vsel %vm309_vm7, %v984_v9, 0.0 }
 0x166   : > { %701 = vpow2.f32 %v383_v56  ;;  %v324_v15 = vadd.f32 %v316_v5, %v315_v0  ;;  %vm310_vm8 = vcmp.eq.s32.totalorder %v1028_v32, %v302_v58  ;;  %v409_v31 = vadd.f32 %v980_v7, %v978_v6  ;;  %v418_v32 = vld [vmem:[#allocation5] sm:$0xff] }
 0x167   : > { %703 = vpow2.f32 %v385_v57  ;;  %v318_v33 = vsel %vm310_vm8, %v986_v10, 0.0  ;;  %v343_v7 = vld [vmem:[#allocation3] sm:$0xff] }
 0x168   : > { %v325_v29 = vadd.f32 %v324_v15, %v317_v26  ;;  %v410_v1 = vadd.f32 %v409_v31, %v984_v9  ;;  %705 = vpow2.f32 %v347_v3  ;;  %v429_v15 = vld [vmem:[%s261_s5] sm:$0xff] }
 0x169   : > { %707 = vpow2.f32 %v349_v4 }
 0x16a   : > { %v690_v59 = vpop.eup %689  ;;  %v326_v34 = vadd.f32 %v325_v29, %v318_v33  ;;  %v411_v2 = vadd.f32 %v410_v1, %v986_v10  ;;  %v430_v29 = vld [vmem:[%s261_s5 + $0x8] sm:$0xff] }
 0x16b   : > { %v692_v60 = vpop.eup %691 }
 0x16c   : > { %v694_v61 = vpop.eup %693  ;;  %v387_v62 = vadd.f32 %v692_v60, %v690_v59  ;;  %v432_v59 = vld [vmem:[#allocation2 + $0x8] sm:$0xff]  ;;  %v459_v60 = vshrl.u32 %v287_v27, 7 }
 0x16d   : > { %v696_v63 = vpop.eup %695 }
 0x16e   : > { %v698_v8 = vpop.eup %697  ;;  %v388_v11 = vadd.f32 %v694_v61, %v387_v62 }
 0x16f   : > { %v700_v12 = vpop.eup %699 }
 0x170   : > { %v389_v13 = vadd.f32 %v696_v63, %v388_v11  ;;  %v392_v14 = vadd.f32 %v700_v12, %v698_v8  ;;  %v702_v16 = vpop.eup %701  ;;  %v461_v63 = vstv %s617_s28  ;;  %v460_v8 = vadd.s32 8, %v459_v60 }
 0x171   : > { %v704_v23 = vpop.eup %703 }
 0x172   : > { %390 = vadd.xlane.f32.xlu1 %v389_v13  ;;  %v393_v17 = vadd.f32 %v702_v16, %v392_v14  ;;  %v706_v6 = vpop.eup %705  ;;  %v462_v16 = vadd.s32 %v461_v63, %v459_v60  ;;  %v463_v19 = vadd.s32 %v461_v63, %v460_v8 }
 0x173   : > { %v351_v9 = vmul.f32 %v706_v6, %v343_v7  ;;  %v708_v10 = vpop.eup %707 }
 0x174   : > { %v394_v28 = vadd.f32 %v704_v23, %v393_v17  ;;  %v352_v41 = vmul.f32 %v708_v10, %v344_v39  ;;  %vm464_vm9 = vcmp.lt.s32.totalorder %v462_v16, 18  ;;  %vm465_vm10 = vcmp.lt.s32.totalorder %v463_v19, 18 }
 0x176   : > { %395 = vadd.xlane.f32.xlu1 %v394_v28 }
 0x17a   : > { %327 = vadd.xlane.f32.xlu1 %v326_v34 }
 0x17b   : > { %v323_v36 = vpop.xlane.xlu0 %322 }
 0x17c   : > { %v420_v37 = vadd.f32 %v418_v32, %v323_v36 }
 0x17e   : > { %407 = vadd.xlane.f32.xlu1 %v406_v35  ;;  %422 = vst.msk [vmem:[#allocation5] sm:$0xff] %vm267_vm0, %v420_v37 }
 0x182   : > { %412 = vadd.xlane.f32.xlu1 %v411_v2 }
 0x185   : > { %v449_v52 = vld [vmem:[#allocation5] sm:$0xff] }
 0x1ff   : > { %v391_v38 = vpop.xlane.xlu1 %390 }
 0x200   : > { %v397_v40 = vadd.f32 %v391_v38, %v351_v9 }
 0x202   : > { %400 = vst.msk [vmem:[#allocation3] sm:$0xff] %vm267_vm0, %v397_v40 }
 0x203   : > { %v396_v42 = vpop.xlane.xlu1 %395 }
 0x204   : > { %v398_v43 = vadd.f32 %v396_v42, %v352_v41 }
 0x206   : > { %401 = vst.msk [vmem:[#allocation3 + $0x8] sm:$0xff] %vm267_vm0, %v398_v43 }
 0x207   : > { %v328_v20 = vpop.xlane.xlu1 %327 }
 0x208   : > { %v421_v22 = vadd.f32 %v419_v18, %v328_v20 }
 0x209   : > { %v433_v24 = vld [vmem:[#allocation3] sm:$0xff] }
 0x20a   : > { %423 = vst.msk [vmem:[#allocation5 + $0x8] sm:$0xff] %vm267_vm0, %v421_v22  ;;  %709 = vlog2.f32 %v433_v24 }
 0x20b   : > { %v408_v25 = vpop.xlane.xlu1 %407 }
 0x20c   : > { %v414_v44 = vadd.f32 %v408_v25, %v402_v21 }
 0x20d   : > { %v434_v46 = vld [vmem:[#allocation3 + $0x8] sm:$0xff] }
 0x20e   : > { %416 = vst.msk [vmem:[#allocation4] sm:$0xff] %vm267_vm0, %v414_v44  ;;  %711 = vlog2.f32 %v434_v46 }
 0x20f   : > { %v413_v47 = vpop.xlane.xlu1 %412 }
 0x210   : > { %v415_v48 = vadd.f32 %v413_v47, %v403_v45 }
 0x211   : > { %v450_v5 = vld [vmem:[#allocation5 + $0x8] sm:$0xff] }
 0x212   : > { %417 = vst.msk [vmem:[#allocation4 + $0x8] sm:$0xff] %vm267_vm0, %v415_v48 }
 0x214   : > { %v710_v49 = vpop.eup %709 }
 0x215   : > { %v436_v50 = vmul.f32 0.6931472, %v710_v49  ;;  %v441_v55 = vld [vmem:[#allocation4] sm:$0xff] }
 0x217   : > { %v439_v53 = vadd.f32 %v436_v50, %v431_v51 }
 0x218   : > { %v712_v54 = vpop.eup %711 }
 0x219   : > { %v438_v56 = vmul.f32 0.6931472, %v712_v54  ;;  %v443_v57 = vmul.f32 512.0, %v439_v53  ;;  %v451_v58 = vsub.f32 %v449_v52, %v439_v53  ;;  %v442_v0 = vld [vmem:[#allocation4 + $0x8] sm:$0xff] }
 0x21b   : > { %v440_v61 = vadd.f32 %v438_v56, %v432_v59  ;;  %v445_v62 = vsub.f32 %v441_v55, %v443_v57  ;;  %v453_v14 = vmul.f32 0.95, %v451_v58 }
 0x21d   : > { %v444_v11 = vmul.f32 512.0, %v440_v61  ;;  %v447_v12 = vmul.f32 9.765625e-05, %v445_v62  ;;  %v452_v13 = vsub.f32 %v450_v5, %v440_v61 }
 0x21f   : > { %v446_v17 = vsub.f32 %v442_v0, %v444_v11  ;;  %v455_v27 = vadd.f32 %v453_v14, %v447_v12  ;;  %v454_v26 = vmul.f32 0.95, %v452_v13 }
 0x221   : > { %v448_v23 = vmul.f32 9.765625e-05, %v446_v17  ;;  %v466_v28 = vmul.f32 %v455_v27, %v429_v15 }
 0x223   : > { %v456_v30 = vadd.f32 %v454_v26, %v448_v23  ;;  %v468_v33 = vsel %vm464_vm9, %v466_v28, 0.0 }
 0x224   : > { %v470_v35 = vsel %vm267_vm0, %v468_v33, 0.0 }
 0x225   : > { %v467_v31 = vmul.f32 %v456_v30, %v430_v29 }
 0x227   : > { %v469_v34 = vsel %vm465_vm10, %v467_v31, 0.0 }
 0x228   : > { %v471_v1 = vsel %vm267_vm0, %v469_v34, 0.0 }
 0x229   : > { %v472_v2 = vadd.f32 %v471_v1, %v470_v35 }
 0x22b   : > { %473 = vadd.xlane.f32.xlu1 %v472_v2 }
 0x2b8   : > { %v474_v32 = vpop.xlane.xlu1 %473 }
 0x2b9   : > { %v475_v36 = vrot.slane %v474_v32, 4 }
 0x2bb   : > { %v476_v37 = vadd.f32 %v475_v36, %v474_v32 }
 0x2bd   : > { %v477_v3 = vrot.slane %v476_v37, 2 }
 0x2bf   : > { %v478_v4 = vadd.f32 %v477_v3, %v476_v37 }
 0x2c1   : > { %v479_v6 = vrot.slane %v478_v4, 1 }
 0x2c3   : > { %v480_v7 = vadd.f32 %v479_v6, %v478_v4 }
 0x2c5   : > { %624 = vpush %v480_v7 }
 0x2f6   : > { %s625_s9 = spop %624 }
 0x2f7   : > { %v482_v9 = vstv %s625_s9 }
 0x2f8   : > { %483 = vst [vmem:[%s243_s7] sm:$0x1] %v482_v9 }
 0x2f9   : > { %754 = shalt.err (!%p751_p4)
}
 0x2fa   : > { %s755_s15 = scalar_lea.hbm %s1087_s22, 16  ;;  %s759_s28 = scalar_lea.hbm %s1137_s3, 32 }
 0x2fb   : > { %p756_p5 = scmp.ne.s32.totalorder %s1087_s22, %s755_s15  ;;  %p760_p7 = scmp.lt.u32.totalorder %s1087_s22, %s1137_s3 }
 0x2fc   : > { %p761_p10 = scmp.lt.u32.totalorder %s759_s28, %s755_s15  ;;  %p763_p11 = scmp.lt.u32.totalorder %s755_s15, %s1087_s22 }
 0x2fd   : > { %p757_p6 = pnand %p756_p5, %p899_p9 }
 0x2fe   : > { %p762_p8 = por %p761_p10, %p760_p7 }
 0x2ff   : > { %p758_p3 = pneg %p757_p6 }
 0x300   : > { %p764_p12 = por %p763_p11, %p762_p8 }
 0x302   : > { %p765_p0 = pnand %p764_p12, %p758_p3 }
 0x304   : > { %768 = shalt.err (!%p765_p0)
}
 0x305   : > { %627 = dma.vmem_to_hbm [thread:$0]  (%p899_p9), %s1080_s8, 16, %s1087_s22, %s485_s27  }
 0x306 PF: > { %s509_s5 = sand.u32 1, %s803_s12   ;;  %p1142_p13 = scmp.ne.s32.totalorder %s1141_s26, 0 }
 0x307   : > { %p1143_p1 = scmp.ge.s32.totalorder %s823_s17, 2  ;;  %s510_s7 = scalar_lea.sflag [#allocation8], %s509_s5 }
 0x309   : > { %p630_p2 = pnand %p1143_p1, %p1142_p13 }
 0x30b   : > { %798 = dma.done.wait (!%p630_p2), %s510_s7, 16  }
 0x30c   : > { %800 = vsyncadd (!%p630_p2), %s510_s7, 4294967280  ;;  %s19_s17 = sadd.s32 1, %s823_s17   ;;  %s1144_s12 = smov %s807_s13 }
 0x30d   : > { %p16_p4 = scmp.ge.s32.totalorder %s19_s17, 4   ;;  %s1145_s13 = smov %s811_s14 }
 0x30e   : > { %s1146_s14 = smov %s904_s25  ;;  %s1147_s15 = smov %s819_s16 }
 0x30f   : > { %s1148_s16 = smov %s1150_s20  ;;  %18 = sbr.rel (!%p16_p4) target bundleno = 6 (0x6), region = 91 }
 0x316   :  { %514 = vsyncpa [#allocation7], 1 }
 0x317   :  { %516 = vsyncpa [#allocation7 + $0x1], 1 }
 0x318   :  { %517 = vsyncpa [#allocation8], 1 }
 0x319   :  { %519 = vsyncpa [#allocation8 + $0x1], 1 }

</bundles_post_ra>
